<compile_context>
chip_gen: v6e
topology: v6e:2x2x1
jax: 0.10.0
libtpu: 0.0.40
codegen_flags: <defaults>
</compile_context>

<pallas_src>
import jax
import jax.numpy as jnp
from jax.experimental import pallas as pl
from jax.experimental.pallas import tpu as pltpu

F_IN, H1, H2, F_OUT = 12, 32, 16, 8


def _round_up(x, m):
    return ((x + m - 1) // m) * m


def mlp_kernel(x_ref, w1_ref, b1_ref, w2_ref, b2_ref, w3_ref, b3_ref, o_ref):
    # One batch tile per grid step; whole (tiny) MLP in a single invocation.
    # Batch sits on the lane axis -> lane-dense compute and unmasked stores.
    x = x_ref[...]                                                  # (12, T)
    h1 = jnp.dot(w1_ref[...], x, preferred_element_type=jnp.float32) + b1_ref[...]
    h1 = jnp.maximum(h1, 0.0)                                       # (32, T)
    h2 = jnp.dot(w2_ref[...], h1, preferred_element_type=jnp.float32) + b2_ref[...]
    h2 = jnp.maximum(h2, 0.0)                                       # (16, T)
    h3 = jnp.dot(w3_ref[...], h2, preferred_element_type=jnp.float32) + b3_ref[...]
    o_ref[...] = h3.astype(o_ref.dtype)                             # (8, T)


def neural_network_forward(x_t, params, tile_b=1024):
    """x_t: (12, B) float32, features-major / batch-on-lanes layout.

    Returns logits_t of shape (8, B). Caller supplies x already transposed
    (no XLA transpose inserted here, per the lane-dense API contract).
    """
    w1, b1 = params["w1"], params["b1"]     # (32, 12), (32, 1)
    w2, b2 = params["w2"], params["b2"]     # (16, 32), (16, 1)
    w3, b3 = params["w3"], params["b3"]     # ( 8, 16), ( 8, 1)

    f_in, B = x_t.shape
    assert f_in == F_IN

    # Cap tile for tiny batches; keep it a multiple of 128 (lane width).
    tile_b = min(tile_b, _round_up(B, 128))
    B_pad = _round_up(B, tile_b)
    if B_pad != B:
        x_t = jnp.pad(x_t, ((0, 0), (0, B_pad - B)))

    grid = (B_pad // tile_b,)

    def const_spec(shape):
        # Full-shape block, constant block index: loaded once, stays resident.
        return pl.BlockSpec(shape, lambda i: (0, 0))

    out_t = pl.pallas_call(
        mlp_kernel,
        out_shape=jax.ShapeDtypeStruct((F_OUT, B_pad), jnp.float32),
        grid=grid,
        in_specs=[
            pl.BlockSpec((F_IN, tile_b), lambda i: (0, i)),   # x tile (streamed)
            const_spec(w1.shape), const_spec(b1.shape),
            const_spec(w2.shape), const_spec(b2.shape),
            const_spec(w3.shape), const_spec(b3.shape),
        ],
        out_specs=pl.BlockSpec((F_OUT, tile_b), lambda i: (0, i)),
        compiler_params=pltpu.CompilerParams(
            dimension_semantics=("parallel",)),
    )(x_t, w1, b1, w2, b2, w3, b3)

    return out_t[:, :B]


def init_params(key):
    """Deterministic init mimicking torch.nn.Linear default
    (uniform +/- 1/sqrt(fan_in)). Weights stored as (out_features, in_features),
    biases as (out_features, 1) — i.e. PyTorch layout, column-broadcast bias."""
    def linear(key, fan_in, fan_out):
        kw, kb = jax.random.split(key)
        bound = 1.0 / jnp.sqrt(fan_in)
        w = jax.random.uniform(kw, (fan_out, fan_in), jnp.float32, -bound, bound)
        b = jax.random.uniform(kb, (fan_out, 1), jnp.float32, -bound, bound)
        return w, b

    k1, k2, k3 = jax.random.split(key, 3)
    w1, b1 = linear(k1, F_IN, H1)
    w2, b2 = linear(k2, H1, H2)
    w3, b3 = linear(k3, H2, F_OUT)   # see TODO(synk) above re: declared Linear(32, 8)
    return dict(w1=w1, b1=b1, w2=w2, b2=b2, w3=w3, b3=b3)


def reference_forward(x, p):
    """Pure-JAX reference in standard (B, features) layout — matches
    torch.nn.Linear semantics: y = x @ W.T + b."""
    h = jnp.maximum(x @ p["w1"].T + p["b1"].T, 0.0)
    h = jnp.maximum(h @ p["w2"].T + p["b2"].T, 0.0)
    return h @ p["w3"].T + p["b3"].T


if __name__ == "__main__":
    key = jax.random.PRNGKey(0)
    k_x, k_p = jax.random.split(key)

    batch = 8
    # PyTorch-style input (B, 12); Flatten(start_dim=1) is a no-op on 2-D input.
    x = jax.random.normal(k_x, (batch, F_IN), dtype=jnp.float32)
    params = init_params(k_p)

    # Lane-dense API: hand the kernel the (features, batch) view.
    logits_t = neural_network_forward(x.T, params)
    jax.block_until_ready(logits_t)

    ref = reference_forward(x, params)
    assert logits_t.shape == (F_OUT, batch)
    assert jnp.allclose(logits_t.T, ref, atol=1e-5, rtol=1e-5)

    print("KERNEL_OK")
</pallas_src>

<mosaic_0001>
module attributes {stable_mosaic.version = 11 : i64} {
  func.func @mlp_kernel(%arg0: i32, %arg1: memref<12x128xf32, #tpu.memory_space<vmem>>, %arg2: memref<32x12xf32, #tpu.memory_space<vmem>>, %arg3: memref<32x1xf32, #tpu.memory_space<vmem>>, %arg4: memref<16x32xf32, #tpu.memory_space<vmem>>, %arg5: memref<16x1xf32, #tpu.memory_space<vmem>>, %arg6: memref<8x16xf32, #tpu.memory_space<vmem>>, %arg7: memref<8x1xf32, #tpu.memory_space<vmem>>, %arg8: memref<8x128xf32, #tpu.memory_space<vmem>>) attributes {dimension_semantics = [#tpu.dimension_semantics<parallel>], iteration_bounds = array<i64: 1>, scalar_prefetch = 0 : i64, scratch_operands = 0 : i64, tpu.core_type = #tpu.core_type<tc>, window_params = [{transform_indices = @transform_0, window_bounds = array<i64: 12, 128>}, {pipeline_mode = #tpu.pipeline_mode<synchronous>, transform_indices = @transform_1, window_bounds = array<i64: 32, 12>}, {pipeline_mode = #tpu.pipeline_mode<synchronous>, transform_indices = @transform_2, window_bounds = array<i64: 32, 1>}, {pipeline_mode = #tpu.pipeline_mode<synchronous>, transform_indices = @transform_3, window_bounds = array<i64: 16, 32>}, {pipeline_mode = #tpu.pipeline_mode<synchronous>, transform_indices = @transform_4, window_bounds = array<i64: 16, 1>}, {pipeline_mode = #tpu.pipeline_mode<synchronous>, transform_indices = @transform_5, window_bounds = array<i64: 8, 16>}, {pipeline_mode = #tpu.pipeline_mode<synchronous>, transform_indices = @transform_6, window_bounds = array<i64: 8, 1>}, {transform_indices = @transform_7, window_bounds = array<i64: 8, 128>}]} {
    %c0 = arith.constant 0 : index
    %c0_0 = arith.constant 0 : index
    %0 = vector.load %arg1[%c0, %c0_0] : memref<12x128xf32, #tpu.memory_space<vmem>>, vector<12x128xf32>
    %c0_1 = arith.constant 0 : index
    %c0_2 = arith.constant 0 : index
    %1 = vector.load %arg2[%c0_1, %c0_2] : memref<32x12xf32, #tpu.memory_space<vmem>>, vector<32x12xf32>
    %cst = arith.constant dense<0.000000e+00> : vector<32x128xf32>
    %2 = tpu.matmul %1, %0, %cst {dimension_numbers = #tpu.dot_dimension_numbers<[1], [0], [0], [1], [0, 0, 1, 1], [], []>} : vector<32x12xf32>, vector<12x128xf32>, vector<32x128xf32> -> vector<32x128xf32>
    %c0_3 = arith.constant 0 : index
    %c0_4 = arith.constant 0 : index
    %3 = vector.load %arg3[%c0_3, %c0_4] : memref<32x1xf32, #tpu.memory_space<vmem>>, vector<32x1xf32>
    %4 = vector.broadcast %3 : vector<32x1xf32> to vector<32x128xf32>
    %5 = arith.addf %2, %4 : vector<32x128xf32>
    %cst_5 = arith.constant 0.000000e+00 : f32
    %6 = vector.broadcast %cst_5 : f32 to vector<32x128xf32>
    %7 = arith.maximumf %5, %6 : vector<32x128xf32>
    %c0_6 = arith.constant 0 : index
    %c0_7 = arith.constant 0 : index
    %8 = vector.load %arg4[%c0_6, %c0_7] : memref<16x32xf32, #tpu.memory_space<vmem>>, vector<16x32xf32>
    %cst_8 = arith.constant dense<0.000000e+00> : vector<16x128xf32>
    %9 = tpu.matmul %8, %7, %cst_8 {dimension_numbers = #tpu.dot_dimension_numbers<[1], [0], [0], [1], [0, 0, 1, 1], [], []>} : vector<16x32xf32>, vector<32x128xf32>, vector<16x128xf32> -> vector<16x128xf32>
    %c0_9 = arith.constant 0 : index
    %c0_10 = arith.constant 0 : index
    %10 = vector.load %arg5[%c0_9, %c0_10] : memref<16x1xf32, #tpu.memory_space<vmem>>, vector<16x1xf32>
    %11 = vector.broadcast %10 : vector<16x1xf32> to vector<16x128xf32>
    %12 = arith.addf %9, %11 : vector<16x128xf32>
    %cst_11 = arith.constant 0.000000e+00 : f32
    %13 = vector.broadcast %cst_11 : f32 to vector<16x128xf32>
    %14 = arith.maximumf %12, %13 : vector<16x128xf32>
    %c0_12 = arith.constant 0 : index
    %c0_13 = arith.constant 0 : index
    %15 = vector.load %arg6[%c0_12, %c0_13] : memref<8x16xf32, #tpu.memory_space<vmem>>, vector<8x16xf32>
    %cst_14 = arith.constant dense<0.000000e+00> : vector<8x128xf32>
    %16 = tpu.matmul %15, %14, %cst_14 {dimension_numbers = #tpu.dot_dimension_numbers<[1], [0], [0], [1], [0, 0, 1, 1], [], []>} : vector<8x16xf32>, vector<16x128xf32>, vector<8x128xf32> -> vector<8x128xf32>
    %c0_15 = arith.constant 0 : index
    %c0_16 = arith.constant 0 : index
    %17 = vector.load %arg7[%c0_15, %c0_16] : memref<8x1xf32, #tpu.memory_space<vmem>>, vector<8x1xf32>
    %18 = vector.broadcast %17 : vector<8x1xf32> to vector<8x128xf32>
    %19 = arith.addf %16, %18 : vector<8x128xf32>
    %c0_17 = arith.constant 0 : index
    %c0_18 = arith.constant 0 : index
    %20 = vector.load %arg8[%c0_17, %c0_18] : memref<8x128xf32, #tpu.memory_space<vmem>>, vector<8x128xf32>
    tpu.vector_store %arg8[%c0_17, %c0_18], %19 {strides = array<i32>} : memref<8x128xf32, #tpu.memory_space<vmem>>, vector<8x128xf32>,
    return
  }
  func.func @transform_0(%arg0: i32) -> (i32, i32) {
    %c0_i32 = arith.constant 0 : i32
    %c0_i32_0 = arith.constant 0 : i32
    return %c0_i32, %arg0 : i32, i32
  }
  func.func @transform_1(%arg0: i32) -> (i32, i32) {
    %c0_i32 = arith.constant 0 : i32
    %c0_i32_0 = arith.constant 0 : i32
    %c0_i32_1 = arith.constant 0 : i32
    return %c0_i32, %c0_i32_0 : i32, i32
  }
  func.func @transform_2(%arg0: i32) -> (i32, i32) {
    %c0_i32 = arith.constant 0 : i32
    %c0_i32_0 = arith.constant 0 : i32
    %c0_i32_1 = arith.constant 0 : i32
    return %c0_i32, %c0_i32_0 : i32, i32
  }
  func.func @transform_3(%arg0: i32) -> (i32, i32) {
    %c0_i32 = arith.constant 0 : i32
    %c0_i32_0 = arith.constant 0 : i32
    %c0_i32_1 = arith.constant 0 : i32
    return %c0_i32, %c0_i32_0 : i32, i32
  }
  func.func @transform_4(%arg0: i32) -> (i32, i32) {
    %c0_i32 = arith.constant 0 : i32
    %c0_i32_0 = arith.constant 0 : i32
    %c0_i32_1 = arith.constant 0 : i32
    return %c0_i32, %c0_i32_0 : i32, i32
  }
  func.func @transform_5(%arg0: i32) -> (i32, i32) {
    %c0_i32 = arith.constant 0 : i32
    %c0_i32_0 = arith.constant 0 : i32
    %c0_i32_1 = arith.constant 0 : i32
    return %c0_i32, %c0_i32_0 : i32, i32
  }
  func.func @transform_6(%arg0: i32) -> (i32, i32) {
    %c0_i32 = arith.constant 0 : i32
    %c0_i32_0 = arith.constant 0 : i32
    %c0_i32_1 = arith.constant 0 : i32
    return %c0_i32, %c0_i32_0 : i32, i32
  }
  func.func @transform_7(%arg0: i32) -> (i32, i32) {
    %c0_i32 = arith.constant 0 : i32
    %c0_i32_0 = arith.constant 0 : i32
    return %c0_i32, %arg0 : i32, i32
  }
}

</mosaic_0001>

<bundles_post_ra>
// kernel: tpu_custom_call.1
= control target key start
LH: loop header
LB: loop body
LE: loop exit
PB: predicated region body
PF: predicated region fallthrough
CT: control target
= control target key end

     0   :  { %vm70_vm0 = vcmask 1043456   ;;  %vm57_vm1 = vcmask 97280   ;;  %v436_v4 = vmov 0   ;;  %s537_s0 = inlined_call_operand.vmem [shape: f32[12,128], index: 0, kind: input, shape index: {}]   ;;  %s538_s1 = inlined_call_operand.vmem [shape: f32[32,12], index: 1, kind: input, shape index: {}]   ;;  %s539_s2 = inlined_call_operand.vmem [shape: f32[32,1], index: 2, kind: input, shape index: {}]   ;;  %s540_s3 = inlined_call_operand.vmem [shape: f32[16,32], index: 3, kind: input, shape index: {}]   ;;  %s541_s4 = inlined_call_operand.vmem [shape: f32[16,1], index: 4, kind: input, shape index: {}]   ;;  %s542_s5 = inlined_call_operand.vmem [shape: f32[8,16], index: 5, kind: input, shape index: {}]   ;;  %s543_s6 = inlined_call_operand.vmem [shape: f32[8,1], index: 6, kind: input, shape index: {}]   ;;  %s544_s7 = inlined_call_operand.hbm [shape: f32[8,128], index: 7, kind: output, shape index: {}]  }
   0x1   :  { %v28_v0 = vld [vmem:[%s537_s0 + $0x8] sm:$0xf]  ;;  %v27_v1 = vld [vmem:[%s537_s0] sm:$0xff]  ;;  %412 = vset.pattern.permute.xlu0 %v436_v4  ;;  %v36_v5 = vld [vmem:[%s539_s2 + $0x18] sm:$0xff]  ;;  %413 = vset.pattern.permute.xlu1 %v436_v4 }
   0x2   :  { %v29_v2 = vld [vmem:[%s538_s1] sm:$0xff]  ;;  %380 = vmatprep.subr.msk.mxu0 %vm70_vm0, %v28_v0  ;;  %v30_v3 = vld [vmem:[%s538_s1 + $0x8] sm:$0xff]  ;;  %v31_v6 = vld [vmem:[%s538_s1 + $0x10] sm:$0xff]  ;;  %54 = vperm.xlu0 %412, %v36_v5  }
   0x3   :  { %384 = vmatprep.mubr.msk.f32.mxu0 %vm57_vm1, %v29_v2  ;;  %381 = vmatpush3.msk.msra.mxu0 %vm70_vm0, %v28_v0  ;;  %v34_v7 = vld [vmem:[%s539_s2 + $0x8] sm:$0xff]  ;;  %v35_v8 = vld [vmem:[%s539_s2 + $0x10] sm:$0xff] }
   0x4   :  { %382 = vmatprep.subr.mxu0 %v27_v1 }
   0x5   :  { %383 = vmatpush3.msra.mxu0 %v27_v1 }
   0x6   :  { %12 = vsyncpa [#allocation3], 0  ;;  %385 = vmatmul.mubr.msk.f32.vlgmr.msra.gmra.mxu0 %vm57_vm1, %v30_v3  ;;  %44 = vperm.xlu1 %413, %v34_v7   ;;  %v32_v9 = vld [vmem:[%s538_s1 + $0x18] sm:$0xff]  ;;  %v33_v10 = vld [vmem:[%s539_s2] sm:$0xff]  ;;  %vm177_vm2 = vcmask 261120   ;;  %v437_v32 = vmov 0.0  }
   0x7   :  { %387 = vmatprep.mubr.msk.f32.mxu0 %vm57_vm1, %v31_v6  ;;  %49 = vperm.xlu0 %412, %v35_v8   ;;  %v166_v11 = vld [vmem:[%s541_s4 + $0x8] sm:$0xff]  ;;  %v165_v12 = vld [vmem:[%s541_s4] sm:$0xff]  ;;  %vm438_vm3 = vmmov 0   ;;  %vm268_vm4 = vcmask 130048  }
   0x8   :  { %v262_v13 = vld [vmem:[%s543_s6] sm:$0xff]  ;;  %v164_v31 = vld [vmem:[%s540_s3 + $0x8] sm:$0xff]  ;;  %401 = vmatprep.subr.mxu0 %v437_v32 }
   0x9   :  { %v163_v14 = vld [vmem:[%s540_s3] sm:$0xff]  ;;  %s439_s3 = smov [#allocation2]  }
   0xa   :  { %388 = vmatmul.mubr.msk.f32.gmra.mxu0 %vm57_vm1, %v32_v9  ;;  %39 = vperm.xlu1 %413, %v33_v10   ;;  %v261_v41 = vld [vmem:[%s542_s5] sm:$0xff]  ;;  %s349_s28 = sshll.u32 %s439_s3, 4  ;;  %s350_s28 = int_to_ptr.vmem [resolvable:$true] %s349_s28 }
   0xb   :  { %174 = vperm.xlu0 %412, %v166_v11   ;;  %398 = vmatprep.mubr.msk.f32.mxu1 %vm177_vm2, %v163_v14  ;;  %s414_s29 = scalar_lea.vmem %s350_s28, 128  ;;  %p419_p1 = scmp.lt.s32.totalorder %s350_s28, %s350_s28 }
   0xc   :  { %405 = vmatprep.mubr.msk.f32.mxu0 %vm438_vm3, %v437_v32  ;;  %p415_p0 = scmp.ne.s32.totalorder %s350_s28, %s414_s29  ;;  %p420_p2 = scmp.lt.s32.totalorder %s414_s29, %s414_s29 }
   0xe   :  { %169 = vperm.xlu1 %413, %v165_v12   ;;  %p421_p3 = por %p420_p2, %p419_p1 }
   0xf   :  { %265 = vperm.xlu0 %412, %v262_v13  }
  0x10   :  { %p422_p4 = pnand %p421_p3, %p415_p0 }
  0x7d   :  { %v55_v15 = vpop.permute.xlu0 %54 }
  0x81   :  { %v45_v16 = vpop.permute.xlu1 %44 }
  0x82   :  { %v50_v20 = vpop.permute.xlu0 %49 }
  0x85   :  { %v40_v22 = vpop.permute.xlu1 %39 }
  0x86   :  { %v175_v33 = vpop.permute.xlu0 %174 }
  0x89   :  { %v170_v36 = vpop.permute.xlu1 %169 }
  0x8a   :  { %v266_v42 = vpop.permute.xlu0 %265 }
  0xc6   :  { %v386_v17 = vpop.f32.mrf.mxu0 }
  0xc7   :  { %v146_v24 = vadd.f32 %v386_v17, %v45_v16 }
  0xc8   :  { %v140_v18 = vpop.f32.mrf.mxu0 }
  0xc9   :  { %v141_v27 = vadd.f32 %v140_v18, %v40_v22  ;;  %v160_v29 = vmax.f32 %v146_v24, 0.0 }
  0xca   :  { %v389_v19 = vpop.f32.mrf.mxu0 }
  0xcb   :  { %v156_v21 = vadd.f32 %v389_v19, %v55_v15  ;;  %v159_v30 = vmax.f32 %v141_v27, 0.0 }
  0xcc   :  { %v150_v23 = vpop.f32.mrf.mxu0 }
  0xcd   :  { %v162_v25 = vmax.f32 %v156_v21, 0.0  ;;  %v151_v26 = vadd.f32 %v150_v23, %v50_v20 }
  0xcf   :  { %v161_v28 = vmax.f32 %v151_v26, 0.0  ;;  %390 = vmatprep.subr.mxu1 %v162_v25 }
  0xd0   :  { %391 = vmatpush3.msra.mxu1 %v162_v25 }
  0xd1   :  { %392 = vmatprep.subr.mxu1 %v161_v28 }
  0xd2   :  { %393 = vmatpush3.msra.mxu1 %v161_v28 }
  0xd3   :  { %394 = vmatprep.subr.mxu1 %v160_v29 }
  0xd4   :  { %395 = vmatpush3.msra.mxu1 %v160_v29 }
  0xd5   :  { %396 = vmatprep.subr.mxu1 %v159_v30 }
  0xd6   :  { %397 = vmatpush3.msra.mxu1 %v159_v30 }
  0xd7   :  { %399 = vmatmul.mubr.msk.f32.vlgmr.msra.gmra.mxu1 %vm177_vm2, %v164_v31 }
 0x197   :  { %v400_v34 = vpop.f32.mrf.mxu1 }
 0x198   :  { %v256_v35 = vadd.f32 %v400_v34, %v175_v33 }
 0x199   :  { %v250_v37 = vpop.f32.mrf.mxu1 }
 0x19a   :  { %v260_v38 = vmax.f32 %v256_v35, 0.0  ;;  %v251_v39 = vadd.f32 %v250_v37, %v170_v36 }
 0x19c   :  { %v259_v40 = vmax.f32 %v251_v39, 0.0  ;;  %402 = vmatpush3.msra.mxu0 %v260_v38 }
 0x19d   :  { %403 = vmatprep.subr.mxu0 %v437_v32 }
 0x19e   :  { %404 = vmatpush3.msra.mxu0 %v259_v40 }
 0x19f   :  { %406 = vmatmul.mubr.msk.f32.vlgmr.msra.gmra.mxu0 %vm268_vm4, %v261_v41 }
 0x25f   :  { %v338_v43 = vpop.f32.mrf.mxu0 }
 0x260   :  { %v339_v44 = vadd.f32 %v338_v43, %v266_v42 }
 0x261   :  { %v407_v45 = vpop.f32.mrf.mxu0 }
 0x262   :  { %342 = vst [vmem:[#allocation2] sm:$0xff] %v339_v44 }
 0x263   :  { %425 = shalt.err (!%p422_p4)
}
 0x264   :  { %352 = dma.vmem_to_hbm [thread:$0]  %s350_s28, 128, %s544_s7, [#allocation3]  }
 0x265   :  { %434 = dma.done.wait [#allocation3], 128  }
 0x266   :  { %435 = vsyncadd [#allocation3], 4294967168 }
 0x267   :  { %356 = vsyncpa [#allocation3], 1 }

</bundles_post_ra>
